<compile_context>
chip_gen: v7x
topology: tpu7x:2x2x1
jax: 0.10.0
libtpu: 0.0.40
codegen_flags: <defaults>
</compile_context>

<pallas_src>
import jax
import jax.numpy as jnp
from jax.experimental import pallas as pl
from jax.experimental.pallas import tpu as pltpu


def _soft_prompt_kernel(emb_ref, out_ref):
    # emb_ref: (1, T*D)  lane-dense prompt row (same block every grid step)
    # out_ref: (BB, T*D) lane-dense slab of the output for this batch tile
    out_ref[...] = jnp.broadcast_to(emb_ref[...], out_ref.shape)


def _pick_batch_block(batch_size: int, row_bytes: int,
                      target_block_bytes: int = 4 * 1024 * 1024) -> int:
    """Largest batch tile whose output block stays ~<= target_block_bytes.

    Keeps 2x (double buffer) x block well under the 16/32 MiB scoped-VMEM
    defaults on all generations (v7x included). Second-to-last block dim must
    be a multiple of 8 unless it spans the full batch axis.
    """
    bb = max(1, min(batch_size, target_block_bytes // max(row_bytes, 1)))
    if bb < batch_size:
        bb = max(8, (bb // 8) * 8)
        bb = min(bb, batch_size)
    return bb


def soft_prompt_forward(embeddings: jax.Array, batch_size: int,
                        block_batch: int | None = None) -> jax.Array:
    """Expand (n_tokens, embedding_dim) prompt embeddings to
    (batch_size, n_tokens, embedding_dim) with a Pallas broadcast kernel."""
    n_tokens, embedding_dim = embeddings.shape
    flat = n_tokens * embedding_dim
    itemsize = jnp.dtype(embeddings.dtype).itemsize

    # Lane-dense views: row of T*D, output slab (B, T*D).
    emb_flat = embeddings.reshape(1, flat)

    bb = block_batch if block_batch is not None else _pick_batch_block(
        batch_size, flat * itemsize)
    bb = max(1, min(bb, batch_size))
    grid = (pl.cdiv(batch_size, bb),)

    cost = pl.CostEstimate(
        flops=0,
        transcendentals=0,
        bytes_accessed=batch_size * flat * itemsize + flat * itemsize,
    )

    out_flat = pl.pallas_call(
        _soft_prompt_kernel,
        out_shape=jax.ShapeDtypeStruct((batch_size, flat), embeddings.dtype),
        grid_spec=pltpu.PrefetchScalarGridSpec(
            num_scalar_prefetch=0,
            grid=grid,
            in_specs=[
                # Full flattened embeddings row, reused at every batch tile.
                pl.BlockSpec((1, flat), lambda b: (0, 0)),
            ],
            out_specs=pl.BlockSpec((bb, flat), lambda b: (b, 0)),
        ),
        compiler_params=pltpu.CompilerParams(
            dimension_semantics=("parallel",),
        ),
        cost_estimate=cost,
    )(emb_flat)

    return out_flat.reshape(batch_size, n_tokens, embedding_dim)


if __name__ == "__main__":
    # Module config (small, consistent with the forward pass semantics).
    n_tokens = 8
    embedding_dim = 32
    batch_size = 2

    # Deterministic parameter init: torch.randn(n_tokens, embedding_dim) * 0.01
    key = jax.random.PRNGKey(0)
    embeddings = (
        jax.random.normal(key, (n_tokens, embedding_dim), dtype=jnp.float32) * 0.01
    )

    out = soft_prompt_forward(embeddings, batch_size)
    out = jax.block_until_ready(out)

    # Correctness check against plain-JAX reference (broadcast expand).
    ref = jnp.broadcast_to(embeddings[None], (batch_size, n_tokens, embedding_dim))
    assert out.shape == (batch_size, n_tokens, embedding_dim)
    assert out.dtype == embeddings.dtype
    assert jnp.array_equal(out, ref)

    print("KERNEL_OK")
</pallas_src>

<mosaic_0001>
module attributes {stable_mosaic.version = 11 : i64} {
  func.func @_soft_prompt_kernel(%arg0: i32, %arg1: memref<1x256xf32, #tpu.memory_space<vmem>>, %arg2: memref<2x256xf32, #tpu.memory_space<vmem>>) attributes {dimension_semantics = [#tpu.dimension_semantics<parallel>], iteration_bounds = array<i64: 1>, scalar_prefetch = 0 : i64, scratch_operands = 0 : i64, tpu.core_type = #tpu.core_type<tc>, window_params = [{pipeline_mode = #tpu.pipeline_mode<synchronous>, transform_indices = @transform_0, window_bounds = array<i64: 1, 256>}, {transform_indices = @transform_1, window_bounds = array<i64: 2, 256>}]} {
    %c0 = arith.constant 0 : index
    %c0_0 = arith.constant 0 : index
    %0 = vector.load %arg1[%c0, %c0_0] : memref<1x256xf32, #tpu.memory_space<vmem>>, vector<1x256xf32>
    %1 = vector.shape_cast %0 : vector<1x256xf32> to vector<1x256xf32>
    %2 = vector.broadcast %1 : vector<1x256xf32> to vector<2x256xf32>
    %c0_1 = arith.constant 0 : index
    %c0_2 = arith.constant 0 : index
    %3 = vector.load %arg2[%c0_1, %c0_2] : memref<2x256xf32, #tpu.memory_space<vmem>>, vector<2x256xf32>
    tpu.vector_store %arg2[%c0_1, %c0_2], %2 {strides = array<i32>} : memref<2x256xf32, #tpu.memory_space<vmem>>, vector<2x256xf32>,
    return
  }
  func.func @transform_0(%arg0: i32) -> (i32, i32) {
    %c0_i32 = arith.constant 0 : i32
    %c0_i32_0 = arith.constant 0 : i32
    %c0_i32_1 = arith.constant 0 : i32
    return %c0_i32, %c0_i32_0 : i32, i32
  }
  func.func @transform_1(%arg0: i32) -> (i32, i32) {
    %c0_i32 = arith.constant 0 : i32
    %c0_i32_0 = arith.constant 0 : i32
    return %arg0, %c0_i32 : i32, i32
  }
}

</mosaic_0001>

<bundles_post_ra>
// kernel: tpu_custom_call.1
= control target key start
LH: loop header
LB: loop body
LE: loop exit
PB: predicated region body
PF: predicated region fallthrough
CT: control target
= control target key end

     0   :  { %6 = vsyncpa [#allocation3], 0  ;;  %s143_s0 = inlined_call_operand.hbm [shape: f32[1,256], index: 0, kind: input, shape index: {}]   ;;  %s144_s1 = inlined_call_operand.hbm [shape: f32[2,256], index: 1, kind: output, shape index: {}]  }
   0x1   :  { %7 = vsyncpa [#allocation4], 0  ;;  %s107_s6 = smov [#allocation2]   ;;  %s59_s10 = scalar_lea.hbm %s143_s0, 32 }
   0x2   :  { %s14_s7 = sshll.u32 %s107_s6, 4  ;;  %p60_p0 = scmp.ne.s32.totalorder %s143_s0, %s59_s10  ;;  %s15_s7 = int_to_ptr.vmem [resolvable:$true] %s14_s7 }
   0x3   :  { %p63_p1 = scmp.lt.u32.totalorder %s59_s10, %s143_s0 }
   0x5   :  { %p65_p2 = pnand %p63_p1, %p60_p0 }
   0x7   :  { %68 = shalt.err (!%p65_p2)
}
   0x8   :  { %s69_s15 = scalar_lea.vmem %s15_s7, 32  ;;  %p74_p4 = scmp.lt.s32.totalorder %s15_s7, %s15_s7 }
   0x9   :  { %p70_p3 = scmp.ne.s32.totalorder %s15_s7, %s69_s15  ;;  %p75_p5 = scmp.lt.s32.totalorder %s69_s15, %s69_s15 }
   0xb   :  { %p76_p6 = por %p75_p5, %p74_p4 }
   0xd   :  { %p77_p7 = pnand %p76_p6, %p70_p3 }
   0xf   :  { %80 = shalt.err (!%p77_p7)
}
  0x10   :  { %17 = dma.hbm_to_vmem [thread:$0]  %s143_s0, 32, %s15_s7, [#allocation3]  }
  0x11   :  { %103 = dma.done.wait [#allocation3], 32  }
  0x12   :  { %104 = vsyncadd [#allocation3], 4294967264  ;;  %v23_v0 = vlaneseq  ;;  %v21_v4 = vld [vmem:[#allocation2] sm:$0x3]  ;;  %s108_s18 = smov [#allocation5]  }
  0x13   :  { %s47_s19 = sshll.u32 %s108_s18, 4  ;;  %s48_s19 = int_to_ptr.vmem [resolvable:$true] %s47_s19 }
  0x14   :  { %v24_v1 = vshrl.u32 %v23_v0, 7  ;;  %s81_s20 = scalar_lea.vmem %s48_s19, 64  ;;  %p86_p9 = scmp.lt.s32.totalorder %s48_s19, %s48_s19 }
  0x15   :  { %p82_p8 = scmp.ne.s32.totalorder %s48_s19, %s81_s20  ;;  %p87_p10 = scmp.lt.s32.totalorder %s81_s20, %s81_s20 }
  0x16   :  { %v25_v2 = vsub.s32 0, %v24_v1  ;;  %v29_v3 = vsub.s32 1, %v24_v1 }
  0x17   :  { %p88_p11 = por %p87_p10, %p86_p9 }
  0x18   :  { %v26_v5 = vrot.slane %v21_v4, %v25_v2  ;;  %v30_v6 = vrot.slane %v21_v4, %v29_v3 }
  0x19   :  { %p89_p12 = pnand %p88_p11, %p82_p8 }
  0x1a   :  { %v31_v7 = vcombine.low %v26_v5, %v30_v6 }
  0x1c   :  { %56 = vst.sshfl [vmem:[#allocation5] sm:$0x33 pattern:$0x76325410] %v31_v7 }
  0x1d   :  { %92 = shalt.err (!%p89_p12)
}
  0x1e   :  { %s93_s22 = scalar_lea.hbm %s144_s1, 64 }
  0x1f   :  { %p94_p13 = scmp.ne.s32.totalorder %s144_s1, %s93_s22  ;;  %p97_p0 = scmp.lt.u32.totalorder %s93_s22, %s144_s1 }
  0x21   :  { %p99_p1 = pnand %p97_p0, %p94_p13 }
  0x23   :  { %102 = shalt.err (!%p99_p1)
}
  0x24   :  { %50 = dma.vmem_to_hbm [thread:$0]  %s48_s19, 64, %s144_s1, [#allocation4]  }
  0x25   :  { %105 = dma.done.wait [#allocation4], 64  }
  0x26   :  { %106 = vsyncadd [#allocation4], 4294967232 }
  0x27   :  { %54 = vsyncpa [#allocation3], 1 }
  0x28   :  { %55 = vsyncpa [#allocation4], 1 }

</bundles_post_ra>
